<compile_context>
chip_gen: v5e
topology: v5e:2x2
jax: 0.10.0
libtpu: 0.0.40
codegen_flags: <defaults>
</compile_context>

<pallas_src>
import functools

import jax
import jax.numpy as jnp
from jax import lax
from jax.experimental import pallas as pl
from jax.experimental.pallas import tpu as pltpu


def _round_up(x, m):
    return ((x + m - 1) // m) * m


def _vmem_cap_bytes():
    """Generation-aware scoped-VMEM cap (v7x: 64 MiB/TC physical; v5e/v6e: 128 MiB)."""
    try:
        kind = jax.devices()[0].device_kind.lower()
    except Exception:
        kind = ""
    if ("v5" in kind) or ("v6" in kind):
        return 96 * 1024 * 1024
    return 48 * 1024 * 1024  # conservative default; fits v7x's 64 MiB per TC


@functools.lru_cache(maxsize=None)
def _single_buffer_supported():
    """One-time eager probe: is pipeline_mode=pl.Buffered(1) usable on this build?"""
    if not hasattr(pl, "Buffered"):
        return False

    def _copy(x_ref, o_ref):
        o_ref[...] = x_ref[...]

    try:
        x = jnp.zeros((8, 128), jnp.float32)
        y = pl.pallas_call(
            _copy,
            out_shape=jax.ShapeDtypeStruct((8, 128), jnp.float32),
            grid=(1,),
            in_specs=[pl.BlockSpec((8, 128), lambda i: (0, 0),
                                   pipeline_mode=pl.Buffered(1))],
            out_specs=pl.BlockSpec((8, 128), lambda i: (0, 0)),
        )(x)
        jax.block_until_ready(y)
        return True
    except Exception:
        return False


def _patch_embed_kernel(x_ref, w_ref, b_ref, o_ref):
    # x_ref: (tm, K)   compute-dtype patch tile (new block every M grid step)
    # w_ref: (K, tn)   compute-dtype weight     (resident; single-buffered when
    #                                            its index map is constant)
    # b_ref: (1, tn)   f32 bias
    # o_ref: (tm, tn)  output tile, lane-dense (tn % 128 == 0)
    acc = jnp.dot(x_ref[...], w_ref[...], preferred_element_type=jnp.float32)
    o_ref[...] = (acc + b_ref[...]).astype(o_ref.dtype)


@functools.partial(jax.jit,
                   static_argnames=("patch_size", "compute_dtype", "out_dtype"))
def patch_embed_forward(x, weight, bias, *, patch_size,
                        compute_dtype=jnp.bfloat16, out_dtype=None):
    """x: [B, C, H, W] (NCHW).  weight: [E, C, ph, pw] (torch Conv2d layout).
    bias: [E].  Returns [B, num_patches, E].

    compute_dtype: MXU operand dtype (bf16 default; pass jnp.float32 for exact
    fp32 Conv2d semantics).  out_dtype: stored dtype (defaults to x.dtype; pass
    jnp.bfloat16 for bf16 pipelines to halve the output HBM stream)."""
    B, C, H, W = x.shape
    ph, pw = patch_size
    E = weight.shape[0]
    assert H % ph == 0 and W % pw == 0, "image size must be divisible by patch size"
    nH, nW = H // ph, W // pw
    N = nH * nW
    K = C * ph * pw
    M = B * N

    out_dtype = x.dtype if out_dtype is None else out_dtype

    # --- glue: patchify + compute-dtype cast.  Keeping astype in the same
    # expression lets XLA fuse the convert into the 6-D transpose copy, so the
    # materialized [M, K] intermediate is written once in compute_dtype.
    # TODO(synk): optionally fuse the patchify in-kernel (memory_space=pl.ANY +
    # per-channel strided DMAs) if a profile shows this copy + the matmul are
    # both HBM-bound; kept as XLA glue here.
    patches = (x.reshape(B, C, nH, ph, nW, pw)
                 .transpose(0, 2, 4, 1, 3, 5)
                 .reshape(M, K)
                 .astype(compute_dtype))
    w_mat = weight.reshape(E, K).T.astype(compute_dtype)      # [K, E]  (tiny)
    b_mat = bias.astype(jnp.float32).reshape(1, E)            # [1, E]  (tiny)

    # --- lane-dense E: only the tiny weight/bias get padded; the output is
    # allocated padded and sliced after.  K is padded only when it is not a
    # multiple of 128 (rare; typical ViT K is 128-aligned -> no extra pass).
    E_pad = _round_up(E, 128)
    if K % 128 == 0:
        K_eff = K
    else:
        K_eff = _round_up(K, 128)
        patches = jnp.pad(patches, ((0, 0), (0, K_eff - K)))
    w_mat = jnp.pad(w_mat, ((0, K_eff - K), (0, E_pad - E)))
    b_mat = jnp.pad(b_mat, ((0, 0), (0, E_pad - E)))

    # --- M tiling: no activation padding.  Ceil-division grid; the ragged last
    # block's out-of-range rows are dropped on store.
    if M <= 256:
        tm = M                 # single block; "full dim" escape of the (8,128) rule
    elif M <= 1024:
        tm = 256               # >= 2 grid steps (v7x megacore), 256-row MXU passes
    else:
        tm = 512

    # --- E tiling only for very wide embeddings; tn stays a multiple of 128 so
    # every store is lane-dense.
    if E_pad >= 1024:
        tn = 512 if E_pad % 512 == 0 else (256 if E_pad % 256 == 0 else 128)
    else:
        tn = E_pad
    grid_n = pl.cdiv(E_pad, tn)

    # Weight/bias index maps are constant when there is no E axis -> no second
    # VMEM buffer needed.
    use_single_buffer = (grid_n == 1) and _single_buffer_supported()
    w_bufs = 1 if use_single_buffer else 2

    # --- VMEM budget: shrink tm if needed, then fail loudly (no silent clamp).
    cbpe = jnp.dtype(compute_dtype).itemsize
    obpe = jnp.dtype(out_dtype).itemsize

    def _vmem_need(tm_):
        return (2 * tm_ * K_eff * cbpe          # patch tile (double-buffered)
                + w_bufs * K_eff * tn * cbpe    # weight
                + 2 * tn * 4                    # bias (f32)
                + 2 * tm_ * tn * obpe)          # output tile (double-buffered)

    cap = _vmem_cap_bytes()
    need = _vmem_need(tm)
    while need + need // 4 > cap and tm > 256:
        tm = max(256, tm // 2)
        need = _vmem_need(tm)
    if need + need // 4 > cap:
        raise ValueError(
            f"PatchEmbed tiles do not fit VMEM: need ~{need} B (+25% headroom), "
            f"cap {cap} B (M={M}, K={K_eff}, E={E_pad}, tm={tm}, tn={tn})")
    grid_m = pl.cdiv(M, tm)
    vmem_limit = int(min(max(need + need // 4, 16 * 1024 * 1024), cap))

    if use_single_buffer:
        w_spec = pl.BlockSpec((K_eff, tn), lambda i, j: (0, j),
                              pipeline_mode=pl.Buffered(1))
        b_spec = pl.BlockSpec((1, tn), lambda i, j: (0, j),
                              pipeline_mode=pl.Buffered(1))
    else:
        w_spec = pl.BlockSpec((K_eff, tn), lambda i, j: (0, j))
        b_spec = pl.BlockSpec((1, tn), lambda i, j: (0, j))

    out = pl.pallas_call(
        _patch_embed_kernel,
        out_shape=jax.ShapeDtypeStruct((M, E_pad), out_dtype),
        grid_spec=pltpu.PrefetchScalarGridSpec(
            num_scalar_prefetch=0,
            grid=(grid_m, grid_n),
            in_specs=[
                pl.BlockSpec((tm, K_eff), lambda i, j: (i, 0)),
                w_spec,
                b_spec,
            ],
            out_specs=pl.BlockSpec((tm, tn), lambda i, j: (i, j)),
        ),
        compiler_params=pltpu.CompilerParams(
            dimension_semantics=("parallel", "parallel"),
            vmem_limit_bytes=vmem_limit,
        ),
    )(patches, w_mat, b_mat)

    if E_pad != E:
        out = out[:, :E]
    return out.reshape(B, N, E)


if __name__ == "__main__":
    def _reference(x, weight, bias, ph, pw):
        # Same math as nn.Conv2d(kernel=stride=patch) + flatten(2).transpose(1,2),
        # on bf16-quantized operands (matches MXU precision: bf16 in, f32 acc).
        xq = x.astype(jnp.bfloat16).astype(jnp.float32)
        wq = weight.astype(jnp.bfloat16).astype(jnp.float32)
        E = weight.shape[0]
        ref = lax.conv_general_dilated(
            xq, wq, window_strides=(ph, pw), padding="VALID",
            dimension_numbers=("NCHW", "OIHW", "NCHW"),
            precision=lax.Precision.HIGHEST,
        ) + bias.reshape(1, E, 1, 1)
        return ref.reshape(x.shape[0], E, -1).transpose(0, 2, 1)

    key = jax.random.PRNGKey(0)

    # Case 1: small shapes consistent with the module
    # (img 16, patch 8, 4 channels, embed 32, batch 2) -> single-block grid.
    B, C, H, W = 2, 4, 16, 16
    ph = pw = 8
    E = 32
    k1, k2, k3, key = jax.random.split(key, 4)
    x = jax.random.normal(k1, (B, C, H, W), dtype=jnp.float32)
    w = jax.random.normal(k2, (E, C, ph, pw), dtype=jnp.float32) * 0.02
    b = jax.random.normal(k3, (E,), dtype=jnp.float32) * 0.02
    out = jax.block_until_ready(patch_embed_forward(x, w, b, patch_size=(ph, pw)))
    assert out.shape == (B, (H // ph) * (W // pw), E)
    assert jnp.allclose(out, _reference(x, w, b, ph, pw), atol=2e-3, rtol=2e-3)

    # Case 2: exercises the tiled, ragged-M path (M = 5*64 = 320 > tm = 256)
    # and the non-128-aligned-K fallback (K = 3*4*4 = 48).
    B, C, H, W = 5, 3, 32, 32
    ph = pw = 4
    E = 32
    k1, k2, k3, key = jax.random.split(key, 4)
    x = jax.random.normal(k1, (B, C, H, W), dtype=jnp.float32)
    w = jax.random.normal(k2, (E, C, ph, pw), dtype=jnp.float32) * 0.02
    b = jax.random.normal(k3, (E,), dtype=jnp.float32) * 0.02
    out = jax.block_until_ready(patch_embed_forward(x, w, b, patch_size=(ph, pw)))
    assert out.shape == (B, (H // ph) * (W // pw), E)
    assert jnp.allclose(out, _reference(x, w, b, ph, pw), atol=2e-3, rtol=2e-3)

    print("KERNEL_OK")
</pallas_src>

<mosaic_0001>
module attributes {stable_mosaic.version = 11 : i64} {
  func.func @_patch_embed_kernel(%arg0: i32, %arg1: i32, %arg2: memref<8x256xbf16, #tpu.memory_space<vmem>>, %arg3: memref<256x128xbf16, #tpu.memory_space<vmem>>, %arg4: memref<1x128xf32, #tpu.memory_space<vmem>>, %arg5: memref<8x128xf32, #tpu.memory_space<vmem>>) attributes {dimension_semantics = [#tpu.dimension_semantics<parallel>, #tpu.dimension_semantics<parallel>], iteration_bounds = array<i64: 1, 1>, scalar_prefetch = 0 : i64, scratch_operands = 0 : i64, tpu.core_type = #tpu.core_type<tc>, window_params = [{transform_indices = @transform_0, window_bounds = array<i64: 8, 256>}, {pipeline_mode = #tpu.pipeline_mode<synchronous>, transform_indices = @transform_1, window_bounds = array<i64: 256, 128>}, {pipeline_mode = #tpu.pipeline_mode<synchronous>, transform_indices = @transform_2, window_bounds = array<i64: 1, 128>}, {transform_indices = @transform_3, window_bounds = array<i64: 8, 128>}]} {
    %c0 = arith.constant 0 : index
    %c0_0 = arith.constant 0 : index
    %0 = vector.load %arg2[%c0, %c0_0] : memref<8x256xbf16, #tpu.memory_space<vmem>>, vector<8x256xbf16>
    %c0_1 = arith.constant 0 : index
    %c0_2 = arith.constant 0 : index
    %1 = vector.load %arg3[%c0_1, %c0_2] : memref<256x128xbf16, #tpu.memory_space<vmem>>, vector<256x128xbf16>
    %cst = arith.constant dense<0.000000e+00> : vector<8x128xf32>
    %2 = tpu.matmul %0, %1, %cst {dimension_numbers = #tpu.dot_dimension_numbers<[1], [0], [0], [1], [0, 0, 1, 1], [], []>} : vector<8x256xbf16>, vector<256x128xbf16>, vector<8x128xf32> -> vector<8x128xf32>
    %c0_3 = arith.constant 0 : index
    %c0_4 = arith.constant 0 : index
    %3 = vector.load %arg4[%c0_3, %c0_4] : memref<1x128xf32, #tpu.memory_space<vmem>>, vector<1x128xf32>
    %4 = vector.broadcast %3 : vector<1x128xf32> to vector<8x128xf32>
    %5 = arith.addf %2, %4 : vector<8x128xf32>
    %c0_5 = arith.constant 0 : index
    %c0_6 = arith.constant 0 : index
    %6 = vector.load %arg5[%c0_5, %c0_6] : memref<8x128xf32, #tpu.memory_space<vmem>>, vector<8x128xf32>
    tpu.vector_store %arg5[%c0_5, %c0_6], %5 {strides = array<i32>} : memref<8x128xf32, #tpu.memory_space<vmem>>, vector<8x128xf32>,
    return
  }
  func.func @transform_0(%arg0: i32, %arg1: i32) -> (i32, i32) {
    %c0_i32 = arith.constant 0 : i32
    %c0_i32_0 = arith.constant 0 : i32
    return %arg0, %c0_i32 : i32, i32
  }
  func.func @transform_1(%arg0: i32, %arg1: i32) -> (i32, i32) {
    %c0_i32 = arith.constant 0 : i32
    %c0_i32_0 = arith.constant 0 : i32
    return %c0_i32, %arg1 : i32, i32
  }
  func.func @transform_2(%arg0: i32, %arg1: i32) -> (i32, i32) {
    %c0_i32 = arith.constant 0 : i32
    %c0_i32_0 = arith.constant 0 : i32
    return %c0_i32, %arg1 : i32, i32
  }
  func.func @transform_3(%arg0: i32, %arg1: i32) -> (i32, i32) {
    %c0_i32 = arith.constant 0 : i32
    return %arg0, %arg1 : i32, i32
  }
}

</mosaic_0001>

<bundles_post_ra>
// kernel: patch_embed_forward.1
= control target key start
LH: loop header
LB: loop body
LE: loop exit
PB: predicated region body
PF: predicated region fallthrough
CT: control target
= control target key end

     0   :  { %s384_s0 = inlined_call_operand.vmem [shape: bf16[8,256], index: 0, kind: input, shape index: {}]   ;;  %s385_s1 = inlined_call_operand.vmem [shape: bf16[256,128], index: 1, kind: input, shape index: {}]   ;;  %s386_s2 = inlined_call_operand.vmem [shape: f32[1,128], index: 2, kind: input, shape index: {}]   ;;  %s387_s3 = inlined_call_operand.hbm [shape: f32[8,128], index: 3, kind: output, shape index: {}]  }
   0x1   :  { %v269_v0 = vld [vmem:[%s385_s1 + $0x38] sm:$0xff]  ;;  %v268_v2 = vld [vmem:[%s385_s1 + $0x30] sm:$0xff]  ;;  %v267_v4 = vld [vmem:[%s385_s1 + $0x28] sm:$0xff] }
   0x2   :  { %v277_v1 = vld [vmem:[%s385_s1 + $0x78] sm:$0xff]  ;;  %155 = vmatpush.bf16.msra.mxu0 %v269_v0  ;;  %v276_v3 = vld [vmem:[%s385_s1 + $0x70] sm:$0xff]  ;;  %v275_v5 = vld [vmem:[%s385_s1 + $0x68] sm:$0xff] }
   0x3   :  { %168 = vmatpush.bf16.msra.mxu1 %v277_v1 }
   0x6   :  { %156 = vmatpush.bf16.msra.mxu0 %v268_v2 }
   0x7   :  { %169 = vmatpush.bf16.msra.mxu1 %v276_v3 }
   0x8   :  { %8 = vsyncpa [#allocation3], 0  ;;  %v266_v6 = vld [vmem:[%s385_s1 + $0x20] sm:$0xff]  ;;  %v265_v8 = vld [vmem:[%s385_s1 + $0x18] sm:$0xff]  ;;  %s306_s20 = smov [#allocation2]   ;;  %s189_s24 = sshll.u32 %s387_s3, 4  ;;  %s190_s24 = int_to_ptr.hbm [resolvable:$true] %s189_s24 }
   0x9   :  { %v274_v7 = vld [vmem:[%s385_s1 + $0x60] sm:$0xff]  ;;  %v273_v9 = vld [vmem:[%s385_s1 + $0x58] sm:$0xff]  ;;  %v264_v10 = vld [vmem:[%s385_s1 + $0x10] sm:$0xff]  ;;  %s187_s21 = sshll.u32 %s306_s20, 4  ;;  %s188_s21 = int_to_ptr.vmem [resolvable:$true] %s187_s21 }
   0xa   :  { %157 = vmatpush.bf16.msra.mxu0 %v267_v4  ;;  %v272_v11 = vld [vmem:[%s385_s1 + $0x50] sm:$0xff]  ;;  %v263_v12 = vld [vmem:[%s385_s1 + $0x8] sm:$0xff]  ;;  %v15_v14 = vld [vmem:[%s384_s0] sm:$0xff] }
   0xb   :  { %170 = vmatpush.bf16.msra.mxu1 %v275_v5  ;;  %v271_v13 = vld [vmem:[%s385_s1 + $0x48] sm:$0xff]  ;;  %v53_v15 = vunpack.c.l.b16 %v15_v14  ;;  %v54_v16 = vunpack.c.h.b16 %v15_v14  ;;  %v262_v17 = vld [vmem:[%s385_s1] sm:$0xff] }
   0xc   :  { %v270_v18 = vld [vmem:[%s385_s1 + $0x40] sm:$0xff] }
   0xd   :  { %v55_v19 = vpack.c.b16 %v53_v15, %v53_v15  ;;  %v56_v20 = vpack.c.b16 %v54_v16, %v54_v16  ;;  %v279_v21 = vld [vmem:[%s386_s2] ss:$0 sm:$0xff] }
   0xe   :  { %158 = vmatpush.bf16.msra.mxu0 %v266_v6 }
   0xf   :  { %171 = vmatpush.bf16.msra.mxu1 %v274_v7 }
  0x12   :  { %159 = vmatpush.bf16.msra.mxu0 %v265_v8 }
  0x13   :  { %172 = vmatpush.bf16.msra.mxu1 %v273_v9 }
  0x16   :  { %160 = vmatpush.bf16.msra.mxu0 %v264_v10 }
  0x17   :  { %173 = vmatpush.bf16.msra.mxu1 %v272_v11 }
  0x1a   :  { %161 = vmatpush.bf16.msra.mxu0 %v263_v12 }
  0x1b   :  { %174 = vmatpush.bf16.msra.mxu1 %v271_v13 }
  0x1e   :  { %162 = vmatpush.bf16.msra.mxu0 %v262_v17 }
  0x1f   :  { %175 = vmatpush.bf16.msra.mxu1 %v270_v18 }
  0x21   :  { %163 = vmatmul.bf16.vlgmr.msra.gmra.mxu0 %v55_v19 }
  0x22   :  { %176 = vmatmul.bf16.vlgmr.msra.gmra.mxu1 %v56_v20 }
  0x9e   :  { %v164_v22 = vpop.f32.mrf.mxu0 }
  0x9f   :  { %v177_v23 = vpop.f32.mrf.mxu1  ;;  %v165_v24 = vadd.f32 %v279_v21, %v164_v22 }
  0xa1   :  { %v178_v25 = vadd.f32 %v177_v23, %v165_v24 }
  0xa3   :  { %181 = vst [vmem:[#allocation2] sm:$0xff] %v178_v25 }
  0xa4   :  { %192 = dma.vmem_to_hbm [thread:$0]  %s188_s21, 128, %s190_s24, [#allocation3]  }
  0xa6   :  { %v166_v26 = vpop.f32.mrf.mxu0 }
  0xa7   :  { %v179_v27 = vpop.f32.mrf.mxu1 }
  0xa8   :  { %304 = dma.done.wait [#allocation3], 128  }
  0xa9   :  { %305 = vsyncadd [#allocation3], 4294967168 }
  0xaa   :  { %197 = vsyncpa [#allocation3], 1 }

</bundles_post_ra>
